<compile_context>
chip_gen: v6e
topology: v6e:2x2x1
jax: 0.10.0
libtpu: 0.0.40
codegen_flags: <defaults>
</compile_context>

<pallas_src>
import jax
import jax.numpy as jnp
from jax.experimental import pallas as pl
from jax.experimental.pallas import tpu as pltpu


def _round_up(x, m):
    return (x + m - 1) // m * m


def _make_conv_film_kernel(has_residual):
    """Fused (Cout,tk)x(tk,TILE) MXU matmul + FiLM + optional residual + ReLU."""

    def kernel(*refs):
        if has_residual:
            a_ref, w_ref, p_ref, r_ref, o_ref, acc_ref = refs
        else:
            a_ref, w_ref, p_ref, o_ref, acc_ref = refs

        k = pl.program_id(2)

        @pl.when(k == 0)
        def _():
            acc_ref[...] = jnp.zeros_like(acc_ref)

        # Single MXU matmul per (batch, spatial-tile, k-tile); f32 accumulation.
        acc_ref[...] += jnp.dot(w_ref[...], a_ref[0],
                                preferred_element_type=jnp.float32)

        @pl.when(k == pl.num_programs(2) - 1)
        def _():
            # FiLM (pre-folded): y = scale * conv + shift, per (batch, channel).
            p = p_ref[0]                               # (Cout, 2) f32
            y = p[:, 0:1] * acc_ref[...] + p[:, 1:2]   # lane-broadcast
            if has_residual:
                y = y + r_ref[0].astype(jnp.float32)   # free VPU cast under MXU
            o_ref[0] = jnp.maximum(y, 0.0).astype(o_ref.dtype)

    return kernel


def conv_block(x_nchw, weight_oihw, bias, gamma, beta, residual=None,
               padding=0, matmul_dtype=None, tile_hw=512, max_tk=2048):
    """Forward of ConvBlock.

    x: (N, Cin, H, W); weight: (Cout, Cin, KH, KW); bias: (Cout,)
    gamma/beta: (N, Cout) or (N, Cout, 1, 1); residual (optional): (N, Cout, Ho, Wo)
    matmul_dtype: dtype of the MXU inputs (jnp.bfloat16 recommended on v5e/v6e/v7x
                  alike); accumulation and the FiLM/ReLU epilogue are always f32.
    tile_hw:      spatial (lane) tile, multiple of 128. Sweep 512/1024/2048.
    max_tk:       max contraction tile; if Cin*KH*KW exceeds it, a reduction grid
                  axis with an f32 accumulator is used.
    Returns (N, Cout, Ho, Wo).
    """
    N, Cin, H, W = x_nchw.shape
    Cout, _, KH, KW = weight_oihw.shape
    Ho = H + 2 * padding - KH + 1
    Wo = W + 2 * padding - KW + 1
    HW = Ho * Wo
    Kdim = Cin * KH * KW
    out_dtype = x_nchw.dtype

    # ---- cast to the matmul dtype BEFORE im2col (the slab is the dominant tensor).
    x = x_nchw if matmul_dtype is None else x_nchw.astype(matmul_dtype)
    w = weight_oihw if matmul_dtype is None else weight_oihw.astype(matmul_dtype)
    mm_itemsize = jnp.dtype(x.dtype).itemsize

    # ---- im2col, channels-first K order (cin, kh, kw) matching the weight reshape,
    # so the kernel output is flattened NCHW: no transposes on output/residual path.
    xp = jnp.pad(x, ((0, 0), (0, 0), (padding, padding), (padding, padding)))
    patches = [xp[:, :, kh:kh + Ho, kw:kw + Wo]
               for kh in range(KH) for kw in range(KW)]        # each (N, Cin, Ho, Wo)
    a = jnp.stack(patches, axis=2).reshape(N, Kdim, HW)
    w2 = w.reshape(Cout, Kdim)

    # ---- K (contraction) tiling. Pad to sublane alignment; 128-align when split
    # (K is the lane dim of the weight block).
    align_k = max(8, 32 // mm_itemsize)                  # 8 f32 / 16 bf16 / 32 int8
    num_k = max(1, -(-Kdim // max(max_tk, 128)))
    if num_k == 1:
        tk = _round_up(Kdim, align_k)
    else:
        tk = _round_up(-(-Kdim // num_k), 128)
    Kdim_p = num_k * tk

    # ---- spatial (lane) tiling. Skip padding entirely when HW % 128 == 0 and fits.
    hw128 = _round_up(HW, 128)
    tile = _round_up(tile_hw, 128)
    if hw128 <= tile:
        tile = hw128
    HWp = _round_up(HW, tile)
    num_s = HWp // tile

    if Kdim_p != Kdim or HWp != HW:
        a = jnp.pad(a, ((0, 0), (0, Kdim_p - Kdim), (0, HWp - HW)))
    if Kdim_p != Kdim:
        w2 = jnp.pad(w2, ((0, 0), (0, Kdim_p - Kdim)))

    # ---- FiLM folded with the conv bias: (1+gamma)*(conv+bias)+beta = scale*conv+shift.
    g2 = gamma.reshape(N, Cout).astype(jnp.float32)
    be2 = beta.reshape(N, Cout).astype(jnp.float32)
    scale = 1.0 + g2
    shift = scale * bias.reshape(1, Cout).astype(jnp.float32) + be2
    params = jnp.stack([scale, shift], axis=-1)          # (N, Cout, 2) f32

    has_res = residual is not None
    if has_res:
        r = residual.reshape(N, Cout, HW)                # native dtype; cast in-kernel
        if HWp != HW:
            r = jnp.pad(r, ((0, 0), (0, 0), (0, HWp - HW)))

    # ---- explicit VMEM budget for the chosen tiles.
    a_bytes = 2 * tk * tile * a.dtype.itemsize
    w_bufs = 1 if num_k == 1 else 2
    w_bytes = w_bufs * Cout * tk * w2.dtype.itemsize
    o_bytes = 2 * Cout * tile * jnp.dtype(out_dtype).itemsize
    p_bytes = 2 * Cout * 2 * 4
    r_bytes = (2 * Cout * tile * r.dtype.itemsize) if has_res else 0
    acc_bytes = Cout * tile * 4
    needed = a_bytes + w_bytes + o_bytes + p_bytes + r_bytes + acc_bytes
    vmem_limit = int(min(max(2 * needed + (2 << 20), 32 << 20), 48 << 20))

    kernel = _make_conv_film_kernel(has_res)

    def build_and_call(single_buffer_weights):
        w_kwargs = {}
        if single_buffer_weights:
            # Weight block index_map is grid-invariant: keep ONE resident copy.
            w_kwargs = dict(pipeline_mode=pl.Buffered(1))
        in_specs = [
            pl.BlockSpec((1, tk, tile), lambda n, s, k: (n, k, s)),      # im2col slab
            pl.BlockSpec((Cout, tk), lambda n, s, k: (0, k), **w_kwargs),  # weights
            pl.BlockSpec((1, Cout, 2), lambda n, s, k: (n, 0, 0)),        # FiLM params
        ]
        args = [a, w2, params]
        if has_res:
            in_specs.append(pl.BlockSpec((1, Cout, tile), lambda n, s, k: (n, 0, s)))
            args.append(r)
        return pl.pallas_call(
            kernel,
            out_shape=jax.ShapeDtypeStruct((N, Cout, HWp), out_dtype),
            grid=(N, num_s, num_k),
            in_specs=in_specs,
            out_specs=pl.BlockSpec((1, Cout, tile), lambda n, s, k: (n, 0, s)),
            scratch_shapes=[pltpu.VMEM((Cout, tile), jnp.float32)],
            compiler_params=pltpu.CompilerParams(
                dimension_semantics=("parallel", "parallel", "arbitrary"),
                vmem_limit_bytes=vmem_limit),
        )(*args)

    try:
        out = build_and_call(single_buffer_weights=(num_k == 1))
    except Exception:
        # pl.Buffered(1) not supported by this runtime -> default double buffering.
        out = build_and_call(single_buffer_weights=False)

    # Unflatten back to NCHW (pure reshape). Only slice off lane padding if it exists;
    # consumers that accept the padded (N, Cout, HWp) layout can skip this copy.
    if HWp != HW:
        out = out[:, :, :HW]
    return out.reshape(N, Cout, Ho, Wo)


def _reference(x, w, b, gamma, beta, padding, residual=None):
    y = jax.lax.conv_general_dilated(
        x, w, window_strides=(1, 1),
        padding=((padding, padding), (padding, padding)),
        dimension_numbers=("NCHW", "OIHW", "NCHW"))
    y = y + b.reshape(1, -1, 1, 1)
    N, C = gamma.shape[0], gamma.shape[1]
    y = (1.0 + gamma.reshape(N, C, 1, 1)) * y + beta.reshape(N, C, 1, 1)
    if residual is not None:
        y = y + residual
    return jnp.maximum(y, 0.0)


if __name__ == "__main__":
    # Small shapes consistent with the module's forward.
    N, Cin, Cout, H, W, K, pad = 2, 4, 8, 16, 16, 3, 1

    key = jax.random.PRNGKey(0)
    kx, kw, kb, kg, kbe, kr, kx4, kw4 = jax.random.split(key, 8)

    x = jax.random.normal(kx, (N, Cin, H, W), jnp.float32)
    fan_in = Cin * K * K
    weight = jax.random.normal(kw, (Cout, Cin, K, K), jnp.float32) / jnp.sqrt(fan_in)
    bias = jax.random.normal(kb, (Cout,), jnp.float32) * 0.1
    gamma = jax.random.normal(kg, (N, Cout, 1, 1), jnp.float32) * 0.1
    beta = jax.random.normal(kbe, (N, Cout, 1, 1), jnp.float32) * 0.1

    # TODO(synk): PyTorch's `if residual:` is only well-defined for None / scalar
    # truthy values; we reproduce the residual=None path as the primary check and
    # additionally exercise the tensor-residual path supported by conv_block.

    # 1) f32 path (HW=256: no lane padding, no K split).
    out = conv_block(x, weight, bias, gamma, beta, residual=None, padding=pad)
    out = jax.block_until_ready(out)
    ref = _reference(x, weight, bias, gamma, beta, pad)
    if not jnp.allclose(out, ref, atol=1e-4, rtol=1e-4):
        raise AssertionError("Pallas ConvBlock (f32) does not match reference")

    # 2) residual path (residual DMA'd in native dtype, cast in-kernel).
    Ho = H + 2 * pad - K + 1
    res = jax.random.normal(kr, (N, Cout, Ho, Ho), jnp.float32) * 0.1
    out_r = conv_block(x, weight, bias, gamma, beta, residual=res, padding=pad)
    out_r = jax.block_until_ready(out_r)
    ref_r = _reference(x, weight, bias, gamma, beta, pad, residual=res)
    if not jnp.allclose(out_r, ref_r, atol=1e-4, rtol=1e-4):
        raise AssertionError("Pallas ConvBlock (residual) does not match reference")

    # 3) bf16 MXU inputs (recommended on v5e/v6e/v7x); f32 accumulation + epilogue.
    out_bf16 = conv_block(x, weight, bias, gamma, beta, residual=None,
                          padding=pad, matmul_dtype=jnp.bfloat16)
    out_bf16 = jax.block_until_ready(out_bf16)
    if not jnp.allclose(out_bf16, ref, atol=3e-2, rtol=3e-2):
        raise AssertionError("Pallas ConvBlock (bf16 matmul) does not match reference")

    # 4) tiling stress: larger Cin -> K split into 2 reduction tiles, padding=0 ->
    #    HW=196 (exercises the lane-pad + trailing-slice path), tile_hw=128 ->
    #    2 spatial tiles per image.
    Cin4 = 16
    x4 = jax.random.normal(kx4, (N, Cin4, H, W), jnp.float32)
    w4 = jax.random.normal(kw4, (Cout, Cin4, K, K), jnp.float32) / jnp.sqrt(Cin4 * K * K)
    out4 = conv_block(x4, w4, bias, gamma, beta, residual=None, padding=0,
                      tile_hw=128, max_tk=128)
    out4 = jax.block_until_ready(out4)
    ref4 = _reference(x4, w4, bias, gamma, beta, 0)
    if not jnp.allclose(out4, ref4, atol=1e-4, rtol=1e-4):
        raise AssertionError("Pallas ConvBlock (tiled/K-split) does not match reference")

    print("KERNEL_OK")
</pallas_src>

<mosaic_0001>
module attributes {stable_mosaic.version = 11 : i64} {
  func.func @kernel(%arg0: i32, %arg1: i32, %arg2: i32, %arg3: memref<1x40x256xf32, #tpu.memory_space<vmem>>, %arg4: memref<8x40xf32, #tpu.memory_space<vmem>>, %arg5: memref<1x8x2xf32, #tpu.memory_space<vmem>>, %arg6: memref<1x8x256xf32, #tpu.memory_space<vmem>>, %arg7: memref<8x256xf32, #tpu.memory_space<vmem>>) attributes {dimension_semantics = [#tpu.dimension_semantics<parallel>, #tpu.dimension_semantics<parallel>, #tpu.dimension_semantics<arbitrary>], iteration_bounds = array<i64: 2, 1, 1>, scalar_prefetch = 0 : i64, scratch_operands = 1 : i64, tpu.core_type = #tpu.core_type<tc>, window_params = [{transform_indices = @transform_0, window_bounds = array<i64: 1, 40, 256>}, {pipeline_mode = #tpu.pipeline_mode<synchronous>, transform_indices = @transform_1, window_bounds = array<i64: 8, 40>}, {transform_indices = @transform_2, window_bounds = array<i64: 1, 8, 2>}, {transform_indices = @transform_3, window_bounds = array<i64: 1, 8, 256>}]} {
    %c0_i32 = arith.constant 0 : i32
    %0 = arith.cmpi eq, %arg2, %c0_i32 : i32
    %1 = arith.extui %0 : i1 to i32
    %c0_i32_0 = arith.constant 0 : i32
    %2 = arith.cmpi ne, %1, %c0_i32_0 : i32
    scf.if %2 {
      %cst_11 = arith.constant 0.000000e+00 : f32
      %13 = vector.broadcast %cst_11 : f32 to vector<8x256xf32>
      %c0_12 = arith.constant 0 : index
      %c0_13 = arith.constant 0 : index
      %14 = vector.load %arg7[%c0_12, %c0_13] : memref<8x256xf32, #tpu.memory_space<vmem>>, vector<8x256xf32>
      tpu.vector_store %arg7[%c0_12, %c0_13], %13 {strides = array<i32>} : memref<8x256xf32, #tpu.memory_space<vmem>>, vector<8x256xf32>,
    } else {
    }
    %c0 = arith.constant 0 : index
    %c0_1 = arith.constant 0 : index
    %3 = vector.load %arg7[%c0, %c0_1] : memref<8x256xf32, #tpu.memory_space<vmem>>, vector<8x256xf32>
    %c0_2 = arith.constant 0 : index
    %c0_3 = arith.constant 0 : index
    %4 = vector.load %arg4[%c0_2, %c0_3] : memref<8x40xf32, #tpu.memory_space<vmem>>, vector<8x40xf32>
    %c0_4 = arith.constant 0 : index
    %c0_5 = arith.constant 0 : index
    %c0_6 = arith.constant 0 : index
    %5 = vector.load %arg3[%c0_4, %c0_5, %c0_6] : memref<1x40x256xf32, #tpu.memory_space<vmem>>, vector<1x40x256xf32>
    %6 = vector.shape_cast %5 : vector<1x40x256xf32> to vector<40x256xf32>
    %cst = arith.constant dense<0.000000e+00> : vector<8x256xf32>
    %7 = tpu.matmul %4, %6, %cst {dimension_numbers = #tpu.dot_dimension_numbers<[1], [0], [0], [1], [0, 0, 1, 1], [], []>} : vector<8x40xf32>, vector<40x256xf32>, vector<8x256xf32> -> vector<8x256xf32>
    %8 = arith.addf %3, %7 : vector<8x256xf32>
    %c0_7 = arith.constant 0 : index
    %c0_8 = arith.constant 0 : index
    %9 = vector.load %arg7[%c0_7, %c0_8] : memref<8x256xf32, #tpu.memory_space<vmem>>, vector<8x256xf32>
    tpu.vector_store %arg7[%c0_7, %c0_8], %8 {strides = array<i32>} : memref<8x256xf32, #tpu.memory_space<vmem>>, vector<8x256xf32>,
    %c0_i32_9 = arith.constant 0 : i32
    %10 = arith.cmpi eq, %arg2, %c0_i32_9 : i32
    %11 = arith.extui %10 : i1 to i32
    %c0_i32_10 = arith.constant 0 : i32
    %12 = arith.cmpi ne, %11, %c0_i32_10 : i32
    scf.if %12 {
      %c0_11 = arith.constant 0 : index
      %c0_12 = arith.constant 0 : index
      %c0_13 = arith.constant 0 : index
      %13 = vector.load %arg5[%c0_11, %c0_12, %c0_13] : memref<1x8x2xf32, #tpu.memory_space<vmem>>, vector<1x8x2xf32>
      %14 = vector.shape_cast %13 : vector<1x8x2xf32> to vector<8x2xf32>
      %15 = vector.extract_strided_slice %14 {offsets = [0, 0], sizes = [8, 1], strides = [1, 1]} : vector<8x2xf32> to vector<8x1xf32>
      %c0_14 = arith.constant 0 : index
      %c0_15 = arith.constant 0 : index
      %16 = vector.load %arg7[%c0_14, %c0_15] : memref<8x256xf32, #tpu.memory_space<vmem>>, vector<8x256xf32>
      %17 = vector.broadcast %15 : vector<8x1xf32> to vector<8x256xf32>
      %18 = arith.mulf %17, %16 : vector<8x256xf32>
      %19 = vector.extract_strided_slice %14 {offsets = [0, 1], sizes = [8, 1], strides = [1, 1]} : vector<8x2xf32> to vector<8x1xf32>
      %20 = vector.broadcast %19 : vector<8x1xf32> to vector<8x256xf32>
      %21 = arith.addf %18, %20 : vector<8x256xf32>
      %cst_16 = arith.constant 0.000000e+00 : f32
      %22 = vector.broadcast %cst_16 : f32 to vector<8x256xf32>
      %23 = arith.maximumf %21, %22 : vector<8x256xf32>
      %c0_17 = arith.constant 0 : index
      %c0_18 = arith.constant 0 : index
      %c0_19 = arith.constant 0 : index
      %24 = vector.load %arg6[%c0_17, %c0_18, %c0_19] : memref<1x8x256xf32, #tpu.memory_space<vmem>>, vector<1x8x256xf32>
      %25 = vector.shape_cast %24 : vector<1x8x256xf32> to vector<8x256xf32>
      %26 = vector.shape_cast %23 : vector<8x256xf32> to vector<1x8x256xf32>
      tpu.vector_store %arg6[%c0_17, %c0_18, %c0_19], %26 {strides = array<i32>} : memref<1x8x256xf32, #tpu.memory_space<vmem>>, vector<1x8x256xf32>,
    } else {
    }
    return
  }
  func.func @transform_0(%arg0: i32, %arg1: i32, %arg2: i32) -> (i32, i32, i32) {
    %c0_i32 = arith.constant 0 : i32
    return %arg0, %arg2, %arg1 : i32, i32, i32
  }
  func.func @transform_1(%arg0: i32, %arg1: i32, %arg2: i32) -> (i32, i32) {
    %c0_i32 = arith.constant 0 : i32
    %c0_i32_0 = arith.constant 0 : i32
    return %c0_i32, %arg2 : i32, i32
  }
  func.func @transform_2(%arg0: i32, %arg1: i32, %arg2: i32) -> (i32, i32, i32) {
    %c0_i32 = arith.constant 0 : i32
    %c0_i32_0 = arith.constant 0 : i32
    %c0_i32_1 = arith.constant 0 : i32
    return %arg0, %c0_i32, %c0_i32_0 : i32, i32, i32
  }
  func.func @transform_3(%arg0: i32, %arg1: i32, %arg2: i32) -> (i32, i32, i32) {
    %c0_i32 = arith.constant 0 : i32
    %c0_i32_0 = arith.constant 0 : i32
    return %arg0, %c0_i32, %arg1 : i32, i32, i32
  }
}

module attributes {stable_mosaic.version = 11 : i64} {
  func.func @kernel(%arg0: i32, %arg1: i32, %arg2: i32, %arg3: memref<1x40x256xf32, #tpu.memory_space<vmem>>, %arg4: memref<8x40xf32, #tpu.memory_space<vmem>>, %arg5: memref<1x8x2xf32, #tpu.memory_space<vmem>>, %arg6: memref<1x8x256xf32, #tpu.memory_space<vmem>>, %arg7: memref<8x256xf32, #tpu.memory_space<vmem>>) attributes {dimension_semantics = [#tpu.dimension_semantics<parallel>, #tpu.dimension_semantics<parallel>, #tpu.dimension_semantics<arbitrary>], iteration_bounds = array<i64: 2, 1, 1>, scalar_prefetch = 0 : i64, scratch_operands = 1 : i64, tpu.core_type = #tpu.core_type<tc>, window_params = [{transform_indices = @transform_0, window_bounds = array<i64: 1, 40, 256>}, {transform_indices = @transform_1, window_bounds = array<i64: 8, 40>}, {transform_indices = @transform_2, window_bounds = array<i64: 1, 8, 2>}, {transform_indices = @transform_3, window_bounds = array<i64: 1, 8, 256>}]} {
    %c0_i32 = arith.constant 0 : i32
    %0 = arith.cmpi eq, %arg2, %c0_i32 : i32
    %1 = arith.extui %0 : i1 to i32
    %c0_i32_0 = arith.constant 0 : i32
    %2 = arith.cmpi ne, %1, %c0_i32_0 : i32
    scf.if %2 {
      %cst_11 = arith.constant 0.000000e+00 : f32
      %13 = vector.broadcast %cst_11 : f32 to vector<8x256xf32>
      %c0_12 = arith.constant 0 : index
      %c0_13 = arith.constant 0 : index
      %14 = vector.load %arg7[%c0_12, %c0_13] : memref<8x256xf32, #tpu.memory_space<vmem>>, vector<8x256xf32>
      tpu.vector_store %arg7[%c0_12, %c0_13], %13 {strides = array<i32>} : memref<8x256xf32, #tpu.memory_space<vmem>>, vector<8x256xf32>,
    } else {
    }
    %c0 = arith.constant 0 : index
    %c0_1 = arith.constant 0 : index
    %3 = vector.load %arg7[%c0, %c0_1] : memref<8x256xf32, #tpu.memory_space<vmem>>, vector<8x256xf32>
    %c0_2 = arith.constant 0 : index
    %c0_3 = arith.constant 0 : index
    %4 = vector.load %arg4[%c0_2, %c0_3] : memref<8x40xf32, #tpu.memory_space<vmem>>, vector<8x40xf32>
    %c0_4 = arith.constant 0 : index
    %c0_5 = arith.constant 0 : index
    %c0_6 = arith.constant 0 : index
    %5 = vector.load %arg3[%c0_4, %c0_5, %c0_6] : memref<1x40x256xf32, #tpu.memory_space<vmem>>, vector<1x40x256xf32>
    %6 = vector.shape_cast %5 : vector<1x40x256xf32> to vector<40x256xf32>
    %cst = arith.constant dense<0.000000e+00> : vector<8x256xf32>
    %7 = tpu.matmul %4, %6, %cst {dimension_numbers = #tpu.dot_dimension_numbers<[1], [0], [0], [1], [0, 0, 1, 1], [], []>} : vector<8x40xf32>, vector<40x256xf32>, vector<8x256xf32> -> vector<8x256xf32>
    %8 = arith.addf %3, %7 : vector<8x256xf32>
    %c0_7 = arith.constant 0 : index
    %c0_8 = arith.constant 0 : index
    %9 = vector.load %arg7[%c0_7, %c0_8] : memref<8x256xf32, #tpu.memory_space<vmem>>, vector<8x256xf32>
    tpu.vector_store %arg7[%c0_7, %c0_8], %8 {strides = array<i32>} : memref<8x256xf32, #tpu.memory_space<vmem>>, vector<8x256xf32>,
    %c0_i32_9 = arith.constant 0 : i32
    %10 = arith.cmpi eq, %arg2, %c0_i32_9 : i32
    %11 = arith.extui %10 : i1 to i32
    %c0_i32_10 = arith.constant 0 : i32
    %12 = arith.cmpi ne, %11, %c0_i32_10 : i32
    scf.if %12 {
      %c0_11 = arith.constant 0 : index
      %c0_12 = arith.constant 0 : index
      %c0_13 = arith.constant 0 : index
      %13 = vector.load %arg5[%c0_11, %c0_12, %c0_13] : memref<1x8x2xf32, #tpu.memory_space<vmem>>, vector<1x8x2xf32>
      %14 = vector.shape_cast %13 : vector<1x8x2xf32> to vector<8x2xf32>
      %15 = vector.extract_strided_slice %14 {offsets = [0, 0], sizes = [8, 1], strides = [1, 1]} : vector<8x2xf32> to vector<8x1xf32>
      %c0_14 = arith.constant 0 : index
      %c0_15 = arith.constant 0 : index
      %16 = vector.load %arg7[%c0_14, %c0_15] : memref<8x256xf32, #tpu.memory_space<vmem>>, vector<8x256xf32>
      %17 = vector.broadcast %15 : vector<8x1xf32> to vector<8x256xf32>
      %18 = arith.mulf %17, %16 : vector<8x256xf32>
      %19 = vector.extract_strided_slice %14 {offsets = [0, 1], sizes = [8, 1], strides = [1, 1]} : vector<8x2xf32> to vector<8x1xf32>
      %20 = vector.broadcast %19 : vector<8x1xf32> to vector<8x256xf32>
      %21 = arith.addf %18, %20 : vector<8x256xf32>
      %cst_16 = arith.constant 0.000000e+00 : f32
      %22 = vector.broadcast %cst_16 : f32 to vector<8x256xf32>
      %23 = arith.maximumf %21, %22 : vector<8x256xf32>
      %c0_17 = arith.constant 0 : index
      %c0_18 = arith.constant 0 : index
      %c0_19 = arith.constant 0 : index
      %24 = vector.load %arg6[%c0_17, %c0_18, %c0_19] : memref<1x8x256xf32, #tpu.memory_space<vmem>>, vector<1x8x256xf32>
      %25 = vector.shape_cast %24 : vector<1x8x256xf32> to vector<8x256xf32>
      %26 = vector.shape_cast %23 : vector<8x256xf32> to vector<1x8x256xf32>
      tpu.vector_store %arg6[%c0_17, %c0_18, %c0_19], %26 {strides = array<i32>} : memref<1x8x256xf32, #tpu.memory_space<vmem>>, vector<1x8x256xf32>,
    } else {
    }
    return
  }
  func.func @transform_0(%arg0: i32, %arg1: i32, %arg2: i32) -> (i32, i32, i32) {
    %c0_i32 = arith.constant 0 : i32
    return %arg0, %arg2, %arg1 : i32, i32, i32
  }
  func.func @transform_1(%arg0: i32, %arg1: i32, %arg2: i32) -> (i32, i32) {
    %c0_i32 = arith.constant 0 : i32
    %c0_i32_0 = arith.constant 0 : i32
    return %c0_i32, %arg2 : i32, i32
  }
  func.func @transform_2(%arg0: i32, %arg1: i32, %arg2: i32) -> (i32, i32, i32) {
    %c0_i32 = arith.constant 0 : i32
    %c0_i32_0 = arith.constant 0 : i32
    %c0_i32_1 = arith.constant 0 : i32
    return %arg0, %c0_i32, %c0_i32_0 : i32, i32, i32
  }
  func.func @transform_3(%arg0: i32, %arg1: i32, %arg2: i32) -> (i32, i32, i32) {
    %c0_i32 = arith.constant 0 : i32
    %c0_i32_0 = arith.constant 0 : i32
    return %arg0, %c0_i32, %arg1 : i32, i32, i32
  }
}

</mosaic_0001>

<bundles_post_ra>
// kernel: tpu_custom_call.1
= control target key start
LH: loop header
LB: loop body
LE: loop exit
PB: predicated region body
PF: predicated region fallthrough
CT: control target
= control target key end

     0   :  { %8 = vsyncpa [#allocation4], 0  ;;  %s876_s0 = inlined_call_operand.hbm [shape: f32[2,40,256], index: 0, kind: input, shape index: {}]   ;;  %s877_s1 = inlined_call_operand.vmem [shape: f32[8,40], index: 1, kind: input, shape index: {}]   ;;  %s878_s2 = inlined_call_operand.vmem [shape: f32[2,8,2], index: 2, kind: input, shape index: {}]   ;;  %s879_s3 = inlined_call_operand.hbm [shape: f32[2,8,256], index: 3, kind: output, shape index: {}]  }
   0x1   :  { %10 = vsyncpa [#allocation4 + $0x1], 0 }
   0x2   :  { %11 = vsyncpa [#allocation5], 0 }
   0x3   :  { %13 = vsyncpa [#allocation5 + $0x1], 0  ;;  %s735_s12 = smov 0   ;;  %s737_s13 = smov 0  }
   0x4   :  { %s739_s14 = smov 0   ;;  %s741_s15 = smov 0  }
   0x5   :  { %s743_s16 = smov 0   ;;  %s745_s17 = smov 0  }
   0x6 LB: > { %s510_s18 = sadd.s32 4294967295, %s706_s17   ;;  %s511_s19 = sadd.s32 4294967294, %s706_s17   ;;  %s706_s17 = sphi %s745_s17, %s19_s17   ;;  %s702_s16 = sphi %s743_s16, %s890_s16   ;;  %s698_s15 = sphi %s741_s15, %s889_s15   ;;  %s694_s14 = sphi %s739_s14, %s888_s14   ;;  %s690_s13 = sphi %s737_s13, %s887_s13   ;;  %s686_s12 = sphi %s735_s12, %s886_s12  }
   0x7   : > { %s38_s20 = sadd.s32 1, %s702_s16  ;;  %s49_s21 = sadd.s32 1, %s694_s14 }
   0x8   : > { %p40_p0 = scmp.ge.s32.totalorder %s38_s20, 2  ;;  %p56_p1 = scmp.ne.s32.totalorder %s694_s14, %s690_s13 }
   0x9   : > { %p57_p2 = scmp.eq.s32.totalorder %s706_s17, 0  ;;  %p62_p3 = scmp.ne.s32.totalorder %s690_s13, %s686_s12 }
   0xa   : > { %s892_s20 = smov (%p40_p0, %s38_s20), 0  ;;  %p63_p5 = scmp.eq.s32.totalorder %s510_s18, 0 }
   0xb   : > { %p776_p4 = por %p57_p2, %p56_p1  ;;  %s42_s23 = ssub.s32 %s702_s16, %s892_s20 }
   0xc   : > { %p140_p6 = scmp.eq.s32.totalorder %s510_s18, 1  ;;  %p47_p7 = scmp.eq.s32.totalorder %s42_s23, 0 }
   0xd   : > { %p782_p8 = por %p63_p5, %p62_p3  ;;  %p146_p10 = scmp.eq.s32.totalorder %s511_s19, 1 }
   0xe   : > { %p786_p9 = por %p140_p6, %p56_p1  ;;  %p541_p13 = scmp.lt.s32.totalorder %s706_s17, 2 }
   0xf   : > { %s791_s26 = scalar_select %p47_p7, %s694_s14, %s49_s21  }
  0x10   : > { %p793_p11 = por %p146_p10, %p62_p3  ;;  %s173_s28 = sand.u32 1, %s694_s14  }
  0x11   : > { %s526_s29 = smul.u32 80, %s173_s28  ;;  %p803_p0 = pnand %p541_p13, %p776_p4 }
  0x12   : > { %s527_s30 = smul.u32 1280, %s702_s16  ;;  %p516_p1 = scmp.ge.s32.totalorder %s706_s17, 1 }
  0x13   : > { %s177_s8 = scalar_lea.vmem [#allocation3], %s526_s29  ;;  %s174_s10 = scalar_lea.sflag [#allocation4], %s173_s28 }
  0x14   : > { %s188_s7 = scalar_lea.hbm %s876_s0, %s527_s30  ;;  %s189_s9 = sshll.u32 %s177_s8, 4  ;;  %s190_s9 = int_to_ptr.vmem [resolvable:$true] %s189_s9 }
  0x15   : > { %p600_p2 = pneg %p803_p0  ;;  %s611_s11 = scalar_lea.vmem %s190_s9, 1280 }
  0x16   : > { %p612_p3 = scmp.ne.s32.totalorder %s190_s9, %s611_s11  ;;  %s708_s18 = smov [#allocation3]  }
  0x17   : > { %s616_s19 = sshll.u32 %s708_s18, 4  ;;  %s617_s19 = int_to_ptr.vmem [resolvable:$false] %s616_s19 }
  0x18   : > { %p614_p5 = pnand %p612_p3, %p600_p2  ;;  %s618_s21 = scalar_lea.vmem %s617_s19, 2560 }
  0x19   : > { %p619_p4 = scmp.lt.s32.totalorder %s190_s9, %s617_s19  ;;  %p620_p7 = scmp.lt.s32.totalorder %s618_s21, %s611_s11 }
  0x1a   : > { %p615_p6 = pneg %p614_p5 }
  0x1b   : > { %p621_p10 = por %p620_p7, %p619_p4 }
  0x1d   : > { %p622_p13 = pnand %p621_p10, %p615_p6 }
  0x1f   : > { %625 = shalt.err (!%p622_p13)
}
  0x20   : > { %s709_s22 = smov 256   ;;  %s710_s23 = smov 16  }
  0x21   : > { %536 = dma.hbm_to_vmem [thread:$0]  (!%p803_p0), %s188_s7, 1280, %s190_s9, %s174_s10, %s709_s22, %s709_s22, %s710_s23  }
  0x22   : > { %p204_p12 = scmp.lt.s32.totalorder %s706_s17, 3 }
  0x24   : > { %p205_p2 = pnand %p516_p1, %p204_p12 }
  0x25   : > { %s819_s28 = sand.u32 (!%p205_p2), 1, %s690_s13  }
  0x26   : > { %208 = sbr.rel (%p205_p2) target bundleno = 270 (0x10e), region = 32  ;;  %s211_s30 = scalar_lea.sflag (!%p205_p2), [#allocation4], %s819_s28 }
  0x27   : > { %s528_s29 = smul.u32 (!%p205_p2), 80, %s819_s28 }
  0x29   : > { %s214_s5 = scalar_lea.vmem (!%p205_p2), [#allocation3], %s528_s29 }
  0x2b   : > { %677 = dma.done.wait (%p782_p8), %s211_s30, 1280  }
  0x2c   : > { %679 = vsyncadd (%p782_p8), %s211_s30, 4294966016  ;;  %p251_p0 = scmp.lt.s32.totalorder %s698_s15, 1  ;;  %v711_v0 = vmov 0.0   ;;  %v712_v1 = vmov 0   ;;  %v274_v2 = vld [vmem:[%s214_s5 + $0x48] sm:$0xff]  ;;  %v273_v3 = vld [vmem:[%s214_s5 + $0x40] sm:$0xff] }
  0x2d   : > { %343 = vmatprep.mubr.f32.mxu0 %v711_v0  ;;  %596 = vset.pattern.permute.xlu0 %v712_v1  ;;  %v272_v4 = vld [vmem:[%s214_s5 + $0x38] sm:$0xff]  ;;  %v271_v5 = vld [vmem:[%s214_s5 + $0x30] sm:$0xff]  ;;  %v270_v6 = vld [vmem:[%s214_s5 + $0x28] sm:$0xff]  ;;  %vm275_vm0 = vcmask 326656   ;;  %v713_v14 = vmov 1   ;;  %s517_s11 = sshll.u32 %s819_s28, 4 }
  0x2e   : > { %s252_s4 = scalar_select %p251_p0, %s698_s15, 1  ;;  %301 = vmatprep.subr.mxu0 %v274_v2  ;;  %v269_v7 = vld [vmem:[%s214_s5 + $0x20] sm:$0xff]  ;;  %v268_v9 = vld [vmem:[%s214_s5 + $0x18] sm:$0xff]  ;;  %v267_v10 = vld [vmem:[%s214_s5 + $0x10] sm:$0xff] }
  0x2f   : > { %302 = vmatpush1.msra.mxu0 %v273_v3  ;;  %v266_v11 = vld [vmem:[%s214_s5 + $0x8] sm:$0xff]  ;;  %v265_v12 = vld [vmem:[%s214_s5] sm:$0xff]  ;;  %s525_s18 = sshll.u32 %s698_s15, 8  ;;  %s244_s19 = scalar_lea.vmem [#allocation6], %s517_s11 }
  0x30   : > { %s518_s6 = sshll.u32 %s252_s4, 3  ;;  %303 = vmatprep.subr.mxu0 %v272_v4  ;;  %v264_v13 = vld [vmem:[%s877_s1] sm:$0xff]  ;;  %s394_s21 = sshll.u32 %s244_s19, 4  ;;  %s395_s21 = int_to_ptr.vmem [resolvable:$true] %s394_s21 }
  0x31   : > { %s254_s9 = scalar_lea.vmem %s878_s2, %s518_s6  ;;  %304 = vmatpush1.msra.mxu0 %v271_v5  ;;  %s392_s29 = scalar_lea.hbm %s879_s3, %s525_s18 }
  0x32   : > { %v357_v8 = vld [vmem:[%s254_s9] sm:$0xff]  ;;  %305 = vmatprep.subr.mxu0 %v270_v6  ;;  %s378_s30 = scalar_lea.sflag [#allocation5], %s819_s28  ;;  %s626_s5 = scalar_lea.vmem %s395_s21, 256 }
  0x33   : > { %362 = vperm.xlu0 %596, %v357_v8   ;;  %306 = vmatpush1.msra.mxu0 %v269_v7  ;;  %p627_p8 = scmp.ne.s32.totalorder %s395_s21, %s626_s5  ;;  %s714_s4 = smov [#allocation6]  }
  0x34   : > { %307 = vmatprep.subr.mxu0 %v268_v9  ;;  %s630_s15 = sshll.u32 %s714_s4, 4  ;;  %s631_s15 = int_to_ptr.vmem [resolvable:$false] %s630_s15 }
  0x35   : > { %308 = vmatpush1.msra.mxu0 %v267_v10  ;;  %p628_p12 = pnand %p627_p8, %p786_p9  ;;  %s632_s6 = scalar_lea.vmem %s631_s15, 512 }
  0x36   : > { %309 = vmatprep.subr.mxu0 %v266_v11  ;;  %p633_p3 = scmp.lt.s32.totalorder %s395_s21, %s631_s15  ;;  %p634_p5 = scmp.lt.s32.totalorder %s632_s6, %s626_s5 }
  0x37   : > { %597 = vset.pattern.permute.xlu0 %v713_v14  ;;  %310 = vmatpush1.msra.mxu0 %v265_v12  ;;  %p629_p1 = pneg %p628_p12 }
  0x38   : > { %368 = vperm.xlu0 %597, %v357_v8   ;;  %519 = vmatmul.mubr.msk.f32.vlgmr.msra.gmra.mxu0 %vm275_vm0, %v264_v13  ;;  %p635_p6 = por %p634_p5, %p633_p3 }
  0x3a   : > { %p636_p4 = pnand %p635_p6, %p629_p1 }
  0xae   : > { %v363_v15 = vpop.permute.xlu0 %362 }
  0xb3   : > { %v369_v17 = vpop.permute.xlu0 %368 }
  0xf8   : > { %v345_v16 = vpop.f32.mrf.mxu0 }
  0xf9   : > { %v365_v18 = vmul.f32 %v363_v15, %v345_v16 }
  0xfa   : > { %v347_v19 = vpop.f32.mrf.mxu0 }
  0xfb   : > { %v371_v20 = vadd.f32 %v369_v17, %v365_v18  ;;  %v366_v21 = vmul.f32 %v363_v15, %v347_v19 }
  0xfd   : > { %v373_v22 = vmax.f32 %v371_v20, 0.0  ;;  %v372_v23 = vadd.f32 %v369_v17, %v366_v21 }
  0xff   : > { %375 = vst [vmem:[%s244_s19] sm:$0xff] %v373_v22  ;;  %v374_v24 = vmax.f32 %v372_v23, 0.0 }
 0x101   : > { %376 = vst [vmem:[%s244_s19 + $0x8] sm:$0xff] %v374_v24 }
 0x102   : > { %639 = shalt.err (!%p636_p4)
}
 0x103   : > { %s640_s7 = scalar_lea.hbm %s392_s29, 256  ;;  %s644_s9 = scalar_lea.hbm %s879_s3, 512 }
 0x104   : > { %p641_p7 = scmp.ne.s32.totalorder %s392_s29, %s640_s7  ;;  %p645_p2 = scmp.lt.s32.totalorder %s392_s29, %s879_s3 }
 0x105   : > { %p646_p0 = scmp.lt.s32.totalorder %s644_s9, %s640_s7 }
 0x106   : > { %p642_p10 = pnand %p641_p7, %p786_p9 }
 0x107   : > { %p647_p8 = por %p646_p0, %p645_p2 }
 0x108   : > { %p643_p13 = pneg %p642_p10 }
 0x10a   : > { %p648_p12 = pnand %p647_p8, %p643_p13 }
 0x10c   : > { %651 = shalt.err (!%p648_p12)
}
 0x10d   : > { %531 = dma.vmem_to_hbm [thread:$0]  (%p786_p9), %s395_s21, 256, %s392_s29, %s378_s30  }
 0x10e PF: > { %s406_s11 = sand.u32 1, %s686_s12   ;;  %p885_p1 = scmp.ge.s32.totalorder %s706_s17, 2 }
 0x10f   : > { %s407_s18 = scalar_lea.sflag [#allocation5], %s406_s11 }
 0x110   : > { %p538_p3 = pnand %p885_p1, %p793_p11 }
 0x112   : > { %p539_p5 = pneg %p538_p3 }
 0x114   : > { %681 = dma.done.wait (%p539_p5), %s407_s18, 256  }
 0x115   : > { %683 = vsyncadd (%p539_p5), %s407_s18, 4294967040  ;;  %s19_s17 = sadd.s32 1, %s706_s17   ;;  %s886_s12 = smov %s690_s13 }
 0x116   : > { %p16_p6 = scmp.ge.s32.totalorder %s19_s17, 4   ;;  %s887_s13 = smov %s694_s14 }
 0x117   : > { %s888_s14 = smov %s791_s26  ;;  %s889_s15 = smov %s702_s16 }
 0x118   : > { %s890_s16 = smov %s892_s20  ;;  %18 = sbr.rel (!%p16_p6) target bundleno = 6 (0x6), region = 91 }
 0x11d   :  { %412 = vsyncpa [#allocation4], 1 }
 0x11e   :  { %414 = vsyncpa [#allocation4 + $0x1], 1 }
 0x11f   :  { %415 = vsyncpa [#allocation5], 1 }
 0x120   :  { %417 = vsyncpa [#allocation5 + $0x1], 1 }

// kernel: tpu_custom_call.1
= control target key start
LH: loop header
LB: loop body
LE: loop exit
PB: predicated region body
PF: predicated region fallthrough
CT: control target
= control target key end

     0   :  { %8 = vsyncpa [#allocation4], 0  ;;  %s876_s0 = inlined_call_operand.hbm [shape: f32[2,40,256], index: 0, kind: input, shape index: {}]   ;;  %s877_s1 = inlined_call_operand.vmem [shape: f32[8,40], index: 1, kind: input, shape index: {}]   ;;  %s878_s2 = inlined_call_operand.vmem [shape: f32[2,8,2], index: 2, kind: input, shape index: {}]   ;;  %s879_s3 = inlined_call_operand.hbm [shape: f32[2,8,256], index: 3, kind: output, shape index: {}]  }
   0x1   :  { %10 = vsyncpa [#allocation4 + $0x1], 0 }
   0x2   :  { %11 = vsyncpa [#allocation5], 0 }
   0x3   :  { %13 = vsyncpa [#allocation5 + $0x1], 0  ;;  %s735_s12 = smov 0   ;;  %s737_s13 = smov 0  }
   0x4   :  { %s739_s14 = smov 0   ;;  %s741_s15 = smov 0  }
   0x5   :  { %s743_s16 = smov 0   ;;  %s745_s17 = smov 0  }
   0x6 LB: > { %s510_s18 = sadd.s32 4294967295, %s706_s17   ;;  %s511_s19 = sadd.s32 4294967294, %s706_s17   ;;  %s706_s17 = sphi %s745_s17, %s19_s17   ;;  %s702_s16 = sphi %s743_s16, %s890_s16   ;;  %s698_s15 = sphi %s741_s15, %s889_s15   ;;  %s694_s14 = sphi %s739_s14, %s888_s14   ;;  %s690_s13 = sphi %s737_s13, %s887_s13   ;;  %s686_s12 = sphi %s735_s12, %s886_s12  }
   0x7   : > { %s38_s20 = sadd.s32 1, %s702_s16  ;;  %s49_s21 = sadd.s32 1, %s694_s14 }
   0x8   : > { %p40_p0 = scmp.ge.s32.totalorder %s38_s20, 2  ;;  %p56_p1 = scmp.ne.s32.totalorder %s694_s14, %s690_s13 }
   0x9   : > { %p57_p2 = scmp.eq.s32.totalorder %s706_s17, 0  ;;  %p62_p3 = scmp.ne.s32.totalorder %s690_s13, %s686_s12 }
   0xa   : > { %s892_s20 = smov (%p40_p0, %s38_s20), 0  ;;  %p63_p5 = scmp.eq.s32.totalorder %s510_s18, 0 }
   0xb   : > { %p776_p4 = por %p57_p2, %p56_p1  ;;  %s42_s23 = ssub.s32 %s702_s16, %s892_s20 }
   0xc   : > { %p140_p6 = scmp.eq.s32.totalorder %s510_s18, 1  ;;  %p47_p7 = scmp.eq.s32.totalorder %s42_s23, 0 }
   0xd   : > { %p782_p8 = por %p63_p5, %p62_p3  ;;  %p146_p10 = scmp.eq.s32.totalorder %s511_s19, 1 }
   0xe   : > { %p786_p9 = por %p140_p6, %p56_p1  ;;  %p541_p13 = scmp.lt.s32.totalorder %s706_s17, 2 }
   0xf   : > { %s791_s26 = scalar_select %p47_p7, %s694_s14, %s49_s21  }
  0x10   : > { %p793_p11 = por %p146_p10, %p62_p3  ;;  %s173_s28 = sand.u32 1, %s694_s14  }
  0x11   : > { %s526_s29 = smul.u32 80, %s173_s28  ;;  %p803_p0 = pnand %p541_p13, %p776_p4 }
  0x12   : > { %s527_s30 = smul.u32 1280, %s702_s16  ;;  %p516_p1 = scmp.ge.s32.totalorder %s706_s17, 1 }
  0x13   : > { %s177_s8 = scalar_lea.vmem [#allocation3], %s526_s29  ;;  %s174_s10 = scalar_lea.sflag [#allocation4], %s173_s28 }
  0x14   : > { %s188_s7 = scalar_lea.hbm %s876_s0, %s527_s30  ;;  %s189_s9 = sshll.u32 %s177_s8, 4  ;;  %s190_s9 = int_to_ptr.vmem [resolvable:$true] %s189_s9 }
  0x15   : > { %p600_p2 = pneg %p803_p0  ;;  %s611_s11 = scalar_lea.vmem %s190_s9, 1280 }
  0x16   : > { %p612_p3 = scmp.ne.s32.totalorder %s190_s9, %s611_s11  ;;  %s708_s18 = smov [#allocation3]  }
  0x17   : > { %s616_s19 = sshll.u32 %s708_s18, 4  ;;  %s617_s19 = int_to_ptr.vmem [resolvable:$false] %s616_s19 }
  0x18   : > { %p614_p5 = pnand %p612_p3, %p600_p2  ;;  %s618_s21 = scalar_lea.vmem %s617_s19, 2560 }
  0x19   : > { %p619_p4 = scmp.lt.s32.totalorder %s190_s9, %s617_s19  ;;  %p620_p7 = scmp.lt.s32.totalorder %s618_s21, %s611_s11 }
  0x1a   : > { %p615_p6 = pneg %p614_p5 }
  0x1b   : > { %p621_p10 = por %p620_p7, %p619_p4 }
  0x1d   : > { %p622_p13 = pnand %p621_p10, %p615_p6 }
  0x1f   : > { %625 = shalt.err (!%p622_p13)
}
  0x20   : > { %s709_s22 = smov 256   ;;  %s710_s23 = smov 16  }
  0x21   : > { %536 = dma.hbm_to_vmem [thread:$0]  (!%p803_p0), %s188_s7, 1280, %s190_s9, %s174_s10, %s709_s22, %s709_s22, %s710_s23  }
  0x22   : > { %p204_p12 = scmp.lt.s32.totalorder %s706_s17, 3 }
  0x24   : > { %p205_p2 = pnand %p516_p1, %p204_p12 }
  0x25   : > { %s819_s28 = sand.u32 (!%p205_p2), 1, %s690_s13  }
  0x26   : > { %208 = sbr.rel (%p205_p2) target bundleno = 270 (0x10e), region = 32  ;;  %s211_s30 = scalar_lea.sflag (!%p205_p2), [#allocation4], %s819_s28 }
  0x27   : > { %s528_s29 = smul.u32 (!%p205_p2), 80, %s819_s28 }
  0x29   : > { %s214_s5 = scalar_lea.vmem (!%p205_p2), [#allocation3], %s528_s29 }
  0x2b   : > { %677 = dma.done.wait (%p782_p8), %s211_s30, 1280  }
  0x2c   : > { %679 = vsyncadd (%p782_p8), %s211_s30, 4294966016  ;;  %p251_p0 = scmp.lt.s32.totalorder %s698_s15, 1  ;;  %v711_v0 = vmov 0.0   ;;  %v712_v1 = vmov 0   ;;  %v274_v2 = vld [vmem:[%s214_s5 + $0x48] sm:$0xff]  ;;  %v273_v3 = vld [vmem:[%s214_s5 + $0x40] sm:$0xff] }
  0x2d   : > { %343 = vmatprep.mubr.f32.mxu0 %v711_v0  ;;  %596 = vset.pattern.permute.xlu0 %v712_v1  ;;  %v272_v4 = vld [vmem:[%s214_s5 + $0x38] sm:$0xff]  ;;  %v271_v5 = vld [vmem:[%s214_s5 + $0x30] sm:$0xff]  ;;  %v270_v6 = vld [vmem:[%s214_s5 + $0x28] sm:$0xff]  ;;  %vm275_vm0 = vcmask 326656   ;;  %v713_v14 = vmov 1   ;;  %s517_s11 = sshll.u32 %s819_s28, 4 }
  0x2e   : > { %s252_s4 = scalar_select %p251_p0, %s698_s15, 1  ;;  %301 = vmatprep.subr.mxu0 %v274_v2  ;;  %v269_v7 = vld [vmem:[%s214_s5 + $0x20] sm:$0xff]  ;;  %v268_v9 = vld [vmem:[%s214_s5 + $0x18] sm:$0xff]  ;;  %v267_v10 = vld [vmem:[%s214_s5 + $0x10] sm:$0xff] }
  0x2f   : > { %302 = vmatpush1.msra.mxu0 %v273_v3  ;;  %v266_v11 = vld [vmem:[%s214_s5 + $0x8] sm:$0xff]  ;;  %v265_v12 = vld [vmem:[%s214_s5] sm:$0xff]  ;;  %s525_s18 = sshll.u32 %s698_s15, 8  ;;  %s244_s19 = scalar_lea.vmem [#allocation6], %s517_s11 }
  0x30   : > { %s518_s6 = sshll.u32 %s252_s4, 3  ;;  %303 = vmatprep.subr.mxu0 %v272_v4  ;;  %v264_v13 = vld [vmem:[%s877_s1] sm:$0xff]  ;;  %s394_s21 = sshll.u32 %s244_s19, 4  ;;  %s395_s21 = int_to_ptr.vmem [resolvable:$true] %s394_s21 }
  0x31   : > { %s254_s9 = scalar_lea.vmem %s878_s2, %s518_s6  ;;  %304 = vmatpush1.msra.mxu0 %v271_v5  ;;  %s392_s29 = scalar_lea.hbm %s879_s3, %s525_s18 }
  0x32   : > { %v357_v8 = vld [vmem:[%s254_s9] sm:$0xff]  ;;  %305 = vmatprep.subr.mxu0 %v270_v6  ;;  %s378_s30 = scalar_lea.sflag [#allocation5], %s819_s28  ;;  %s626_s5 = scalar_lea.vmem %s395_s21, 256 }
  0x33   : > { %362 = vperm.xlu0 %596, %v357_v8   ;;  %306 = vmatpush1.msra.mxu0 %v269_v7  ;;  %p627_p8 = scmp.ne.s32.totalorder %s395_s21, %s626_s5  ;;  %s714_s4 = smov [#allocation6]  }
  0x34   : > { %307 = vmatprep.subr.mxu0 %v268_v9  ;;  %s630_s15 = sshll.u32 %s714_s4, 4  ;;  %s631_s15 = int_to_ptr.vmem [resolvable:$false] %s630_s15 }
  0x35   : > { %308 = vmatpush1.msra.mxu0 %v267_v10  ;;  %p628_p12 = pnand %p627_p8, %p786_p9  ;;  %s632_s6 = scalar_lea.vmem %s631_s15, 512 }
  0x36   : > { %309 = vmatprep.subr.mxu0 %v266_v11  ;;  %p633_p3 = scmp.lt.s32.totalorder %s395_s21, %s631_s15  ;;  %p634_p5 = scmp.lt.s32.totalorder %s632_s6, %s626_s5 }
  0x37   : > { %597 = vset.pattern.permute.xlu0 %v713_v14  ;;  %310 = vmatpush1.msra.mxu0 %v265_v12  ;;  %p629_p1 = pneg %p628_p12 }
  0x38   : > { %368 = vperm.xlu0 %597, %v357_v8   ;;  %519 = vmatmul.mubr.msk.f32.vlgmr.msra.gmra.mxu0 %vm275_vm0, %v264_v13  ;;  %p635_p6 = por %p634_p5, %p633_p3 }
  0x3a   : > { %p636_p4 = pnand %p635_p6, %p629_p1 }
  0xae   : > { %v363_v15 = vpop.permute.xlu0 %362 }
  0xb3   : > { %v369_v17 = vpop.permute.xlu0 %368 }
  0xf8   : > { %v345_v16 = vpop.f32.mrf.mxu0 }
  0xf9   : > { %v365_v18 = vmul.f32 %v363_v15, %v345_v16 }
  0xfa   : > { %v347_v19 = vpop.f32.mrf.mxu0 }
  0xfb   : > { %v371_v20 = vadd.f32 %v369_v17, %v365_v18  ;;  %v366_v21 = vmul.f32 %v363_v15, %v347_v19 }
  0xfd   : > { %v373_v22 = vmax.f32 %v371_v20, 0.0  ;;  %v372_v23 = vadd.f32 %v369_v17, %v366_v21 }
  0xff   : > { %375 = vst [vmem:[%s244_s19] sm:$0xff] %v373_v22  ;;  %v374_v24 = vmax.f32 %v372_v23, 0.0 }
 0x101   : > { %376 = vst [vmem:[%s244_s19 + $0x8] sm:$0xff] %v374_v24 }
 0x102   : > { %639 = shalt.err (!%p636_p4)
}
 0x103   : > { %s640_s7 = scalar_lea.hbm %s392_s29, 256  ;;  %s644_s9 = scalar_lea.hbm %s879_s3, 512 }
 0x104   : > { %p641_p7 = scmp.ne.s32.totalorder %s392_s29, %s640_s7  ;;  %p645_p2 = scmp.lt.s32.totalorder %s392_s29, %s879_s3 }
 0x105   : > { %p646_p0 = scmp.lt.s32.totalorder %s644_s9, %s640_s7 }
 0x106   : > { %p642_p10 = pnand %p641_p7, %p786_p9 }
 0x107   : > { %p647_p8 = por %p646_p0, %p645_p2 }
 0x108   : > { %p643_p13 = pneg %p642_p10 }
 0x10a   : > { %p648_p12 = pnand %p647_p8, %p643_p13 }
 0x10c   : > { %651 = shalt.err (!%p648_p12)
}
 0x10d   : > { %531 = dma.vmem_to_hbm [thread:$0]  (%p786_p9), %s395_s21, 256, %s392_s29, %s378_s30  }
 0x10e PF: > { %s406_s11 = sand.u32 1, %s686_s12   ;;  %p885_p1 = scmp.ge.s32.totalorder %s706_s17, 2 }
 0x10f   : > { %s407_s18 = scalar_lea.sflag [#allocation5], %s406_s11 }
 0x110   : > { %p538_p3 = pnand %p885_p1, %p793_p11 }
 0x112   : > { %p539_p5 = pneg %p538_p3 }
 0x114   : > { %681 = dma.done.wait (%p539_p5), %s407_s18, 256  }
 0x115   : > { %683 = vsyncadd (%p539_p5), %s407_s18, 4294967040  ;;  %s19_s17 = sadd.s32 1, %s706_s17   ;;  %s886_s12 = smov %s690_s13 }
 0x116   : > { %p16_p6 = scmp.ge.s32.totalorder %s19_s17, 4   ;;  %s887_s13 = smov %s694_s14 }
 0x117   : > { %s888_s14 = smov %s791_s26  ;;  %s889_s15 = smov %s702_s16 }
 0x118   : > { %s890_s16 = smov %s892_s20  ;;  %18 = sbr.rel (!%p16_p6) target bundleno = 6 (0x6), region = 91 }
 0x11d   :  { %412 = vsyncpa [#allocation4], 1 }
 0x11e   :  { %414 = vsyncpa [#allocation4 + $0x1], 1 }
 0x11f   :  { %415 = vsyncpa [#allocation5], 1 }
 0x120   :  { %417 = vsyncpa [#allocation5 + $0x1], 1 }

</bundles_post_ra>
